<compile_context>
chip_gen: v7x
topology: tpu7x:2x2x1
jax: 0.10.0
libtpu: 0.0.40
codegen_flags: <defaults>
</compile_context>

<pallas_src>
import functools

import jax
import jax.numpy as jnp
from jax import lax
from jax.experimental import pallas as pl
from jax.experimental.pallas import tpu as pltpu

_LANE = 128


def _channel_attention_kernel(x_ref, w1_ref, w2_ref, out_ref,
                              sum_ref, max_ref, *, hw, hw_tile):
    """x_ref: (Bt, C, hw_tile); w1: (Cr, C); w2: (C, Cr); out_ref: (Bt, 1, C)."""
    k = pl.program_id(1)
    last = pl.num_programs(1) - 1

    num_hw = -(-hw // hw_tile)              # static
    rem = hw - (num_hw - 1) * hw_tile       # static: valid lanes in last tile
    ragged = rem != hw_tile
    nchunks = hw_tile // _LANE

    @pl.when(k == 0)
    def _init():
        sum_ref[...] = jnp.zeros_like(sum_ref)
        max_ref[...] = jnp.full(max_ref.shape, -jnp.inf, dtype=max_ref.dtype)

    def accumulate(limit):
        # Lane-resident, VPU-only accumulation: one vadd + one vmax per
        # 128-lane chunk; no cross-lane reduce / relayout per tile.
        for c in range(nchunks):
            lo = c * _LANE
            if lo >= limit:
                break                                   # fully padded chunk
            xc = x_ref[:, :, lo:lo + _LANE].astype(jnp.float32)  # (Bt, C, 128)
            if lo + _LANE > limit:                      # straddling chunk: mask
                pos = lax.broadcasted_iota(jnp.int32, xc.shape, 2) + lo
                valid = pos < limit
                xs = jnp.where(valid, xc, 0.0)
                xm = jnp.where(valid, xc, -jnp.inf)
            else:
                xs, xm = xc, xc
            sum_ref[...] += xs
            max_ref[...] = jnp.maximum(max_ref[...], xm)

    if not ragged:
        accumulate(hw_tile)
    elif num_hw == 1:
        accumulate(rem)
    else:
        @pl.when(k < last)
        def _full_tiles():
            accumulate(hw_tile)

        @pl.when(k == last)
        def _tail_tile():
            accumulate(rem)

    @pl.when(k == last)
    def _finalize():
        # One cross-lane reduce per batch block, then the tiny shared MLP.
        avg = jnp.sum(sum_ref[...], axis=-1) * (1.0 / hw)          # (Bt, C)
        mx = jnp.max(max_ref[...], axis=-1)                        # (Bt, C)

        w1 = w1_ref[...].astype(jnp.float32)                       # (Cr, C)
        w2 = w2_ref[...].astype(jnp.float32)                       # (C, Cr)
        contract_last = (((1,), (1,)), ((), ()))                   # p @ w.T

        def mlp(p):
            h = jnp.maximum(
                lax.dot_general(p, w1, contract_last,
                                preferred_element_type=jnp.float32), 0.0)
            return lax.dot_general(h, w2, contract_last,
                                   preferred_element_type=jnp.float32)

        out = jax.nn.sigmoid(mlp(avg) + mlp(mx))                   # (Bt, C)
        out_ref[...] = out.reshape(out_ref.shape).astype(out_ref.dtype)


def channel_attention(x, w1, w2, *, max_hw_tile=4096,
                      max_block_bytes=8 * 1024 * 1024,
                      target_block_bytes=4 * 1024 * 1024):
    """x: (B, C, H, W); w1: (Cr, C) [1x1 conv weight squeezed]; w2: (C, Cr).

    Returns (B, C, 1, 1) sigmoid channel-attention weights (PyTorch semantics).
    """
    B, C, H, W = x.shape
    Cr, c1 = w1.shape
    assert c1 == C and w2.shape == (C, Cr)
    HW = H * W
    itemsize = jnp.dtype(x.dtype).itemsize

    x_flat = x.reshape(B, C, HW)

    # --- spatial (lane) tile: always a multiple of 128 so the kernel does
    # pure-VPU 128-lane chunk accumulation; byte-capped so double-buffered
    # blocks stay far below the 64 MiB v7x / 128 MiB v5e-v6e VMEM budgets.
    cap_elems = max(_LANE,
                    (max_block_bytes // max(1, C * itemsize)) // _LANE * _LANE)
    eff_max = max(_LANE, min(max_hw_tile, cap_elems))
    hw_padded = -(-HW // _LANE) * _LANE
    if hw_padded <= eff_max:
        hw_tile = hw_padded                 # one tile (masked tail if ragged)
    else:
        hw_tile = 0
        t = eff_max
        while t >= _LANE:                   # prefer a tile that divides HW
            if HW % t == 0:
                hw_tile = t
                break
            t -= _LANE
        if hw_tile == 0:
            hw_tile = eff_max               # ragged tail, masked in-kernel
    num_hw = pl.cdiv(HW, hw_tile)

    # --- batch blocking: grow per-step footprint toward ~1-4 MiB so small
    # C / HW shapes are HBM-bound rather than grid-overhead-bound.
    x_block_bytes = C * hw_tile * itemsize
    bt = 1
    for d in range(1, B + 1):
        if B % d == 0 and d * x_block_bytes <= target_block_bytes:
            bt = d

    w_itemsize = jnp.dtype(w1.dtype).itemsize
    needed = (2 * bt * x_block_bytes               # double-buffered x block
              + 2 * 2 * C * Cr * w_itemsize        # resident weights
              + 2 * bt * C * itemsize              # output block
              + 2 * bt * C * _LANE * 4)            # f32 lane-resident accumulators
    # Above v5e's 16 MiB scoped default, comfortably below v7x's 64 MiB VMEM.
    vmem_limit = int(min(48 * 1024 * 1024, max(16 * 1024 * 1024, 2 * needed)))

    kernel = functools.partial(_channel_attention_kernel, hw=HW, hw_tile=hw_tile)

    # TODO(synk): for B == 1 on v7x (2 TensorCores) split the spatial reduction
    # across cores (per-core partial sum/max + tiny combine pass) instead of
    # leaving one core idle.
    out = pl.pallas_call(
        kernel,
        out_shape=jax.ShapeDtypeStruct((B, 1, C), x.dtype),
        grid=(B // bt, num_hw),
        in_specs=[
            pl.BlockSpec((bt, C, hw_tile), lambda b, k: (b, 0, k)),
            pl.BlockSpec((Cr, C), lambda b, k: (0, 0)),   # resident weight 1
            pl.BlockSpec((C, Cr), lambda b, k: (0, 0)),   # resident weight 2
        ],
        out_specs=pl.BlockSpec((bt, 1, C), lambda b, k: (b, 0, 0)),
        scratch_shapes=[
            pltpu.VMEM((bt, C, _LANE), jnp.float32),   # lane-resident running sum
            pltpu.VMEM((bt, C, _LANE), jnp.float32),   # lane-resident running max
        ],
        compiler_params=pltpu.CompilerParams(
            dimension_semantics=("parallel", "arbitrary"),
            vmem_limit_bytes=vmem_limit,
        ),
    )(x_flat, w1, w2)

    return out.reshape(B, C, 1, 1)


def _reference(x, w1, w2):
    """Pure-JAX reference mirroring the PyTorch forward."""
    avg = jnp.mean(x, axis=(2, 3))                      # (B, C)
    mx = jnp.max(x, axis=(2, 3))                        # (B, C)

    def mlp(p):
        h = jnp.maximum(p @ w1.T, 0.0)
        return h @ w2.T

    out = jax.nn.sigmoid(mlp(avg) + mlp(mx))
    return out[:, :, None, None]


if __name__ == "__main__":
    # Shapes consistent with the module: reduction_ratio=16 -> need C >= 16.
    B, C, H, W = 2, 64, 16, 16
    reduction_ratio = 16
    Cr = C // reduction_ratio  # 4

    key = jax.random.PRNGKey(0)
    kx, kw1, kw2 = jax.random.split(key, 3)

    x = jax.random.normal(kx, (B, C, H, W), dtype=jnp.float32)
    # Deterministic synthetic parameters (Conv2d 1x1, bias=False), Kaiming-ish scale.
    w1 = jax.random.normal(kw1, (Cr, C), dtype=jnp.float32) * (2.0 / C) ** 0.5
    w2 = jax.random.normal(kw2, (C, Cr), dtype=jnp.float32) * (2.0 / Cr) ** 0.5

    out = channel_attention(x, w1, w2)
    out = jax.block_until_ready(out)

    ref = _reference(x, w1, w2)
    assert out.shape == (B, C, 1, 1)
    assert jnp.allclose(out, ref, atol=1e-5, rtol=1e-5)

    print("KERNEL_OK")
</pallas_src>

<mosaic_0001>
module attributes {stable_mosaic.version = 11 : i64} {
  func.func @_channel_attention_kernel(%arg0: i32, %arg1: i32, %arg2: memref<2x64x256xf32, #tpu.memory_space<vmem>>, %arg3: memref<4x64xf32, #tpu.memory_space<vmem>>, %arg4: memref<64x4xf32, #tpu.memory_space<vmem>>, %arg5: memref<2x1x64xf32, #tpu.memory_space<vmem>>, %arg6: memref<2x64x128xf32, #tpu.memory_space<vmem>>, %arg7: memref<2x64x128xf32, #tpu.memory_space<vmem>>) attributes {dimension_semantics = [#tpu.dimension_semantics<parallel>, #tpu.dimension_semantics<arbitrary>], iteration_bounds = array<i64: 1, 1>, scalar_prefetch = 0 : i64, scratch_operands = 2 : i64, tpu.core_type = #tpu.core_type<tc>, window_params = [{transform_indices = @transform_0, window_bounds = array<i64: 2, 64, 256>}, {pipeline_mode = #tpu.pipeline_mode<synchronous>, transform_indices = @transform_1, window_bounds = array<i64: 4, 64>}, {pipeline_mode = #tpu.pipeline_mode<synchronous>, transform_indices = @transform_2, window_bounds = array<i64: 64, 4>}, {transform_indices = @transform_3, window_bounds = array<i64: 2, 1, 64>}]} {
    %c0_i32 = arith.constant 0 : i32
    %0 = arith.cmpi eq, %arg1, %c0_i32 : i32
    %1 = arith.extui %0 : i1 to i32
    %c0_i32_0 = arith.constant 0 : i32
    %2 = arith.cmpi ne, %1, %c0_i32_0 : i32
    scf.if %2 {
      %cst = arith.constant 0.000000e+00 : f32
      %20 = vector.broadcast %cst : f32 to vector<2x64x128xf32>
      %c0_31 = arith.constant 0 : index
      %c0_32 = arith.constant 0 : index
      %c0_33 = arith.constant 0 : index
      %21 = vector.load %arg6[%c0_31, %c0_32, %c0_33] : memref<2x64x128xf32, #tpu.memory_space<vmem>>, vector<2x64x128xf32>
      tpu.vector_store %arg6[%c0_31, %c0_32, %c0_33], %20 {strides = array<i32>} : memref<2x64x128xf32, #tpu.memory_space<vmem>>, vector<2x64x128xf32>,
      %cst_34 = arith.constant 0xFF800000 : f32
      %22 = vector.broadcast %cst_34 : f32 to vector<2x64x128xf32>
      %c0_35 = arith.constant 0 : index
      %c0_36 = arith.constant 0 : index
      %c0_37 = arith.constant 0 : index
      %23 = vector.load %arg7[%c0_35, %c0_36, %c0_37] : memref<2x64x128xf32, #tpu.memory_space<vmem>>, vector<2x64x128xf32>
      tpu.vector_store %arg7[%c0_35, %c0_36, %c0_37], %22 {strides = array<i32>} : memref<2x64x128xf32, #tpu.memory_space<vmem>>, vector<2x64x128xf32>,
    } else {
    }
    %c0 = arith.constant 0 : index
    %c0_1 = arith.constant 0 : index
    %c0_2 = arith.constant 0 : index
    %3 = vector.load %arg2[%c0, %c0_1, %c0_2] : memref<2x64x256xf32, #tpu.memory_space<vmem>>, vector<2x64x128xf32>
    %c0_3 = arith.constant 0 : index
    %c0_4 = arith.constant 0 : index
    %c0_5 = arith.constant 0 : index
    %4 = vector.load %arg6[%c0_3, %c0_4, %c0_5] : memref<2x64x128xf32, #tpu.memory_space<vmem>>, vector<2x64x128xf32>
    %5 = arith.addf %4, %3 : vector<2x64x128xf32>
    %c0_6 = arith.constant 0 : index
    %c0_7 = arith.constant 0 : index
    %c0_8 = arith.constant 0 : index
    %6 = vector.load %arg6[%c0_6, %c0_7, %c0_8] : memref<2x64x128xf32, #tpu.memory_space<vmem>>, vector<2x64x128xf32>
    tpu.vector_store %arg6[%c0_6, %c0_7, %c0_8], %5 {strides = array<i32>} : memref<2x64x128xf32, #tpu.memory_space<vmem>>, vector<2x64x128xf32>,
    %c0_9 = arith.constant 0 : index
    %c0_10 = arith.constant 0 : index
    %c0_11 = arith.constant 0 : index
    %7 = vector.load %arg7[%c0_9, %c0_10, %c0_11] : memref<2x64x128xf32, #tpu.memory_space<vmem>>, vector<2x64x128xf32>
    %8 = arith.maximumf %7, %3 : vector<2x64x128xf32>
    %c0_12 = arith.constant 0 : index
    %c0_13 = arith.constant 0 : index
    %c0_14 = arith.constant 0 : index
    %9 = vector.load %arg7[%c0_12, %c0_13, %c0_14] : memref<2x64x128xf32, #tpu.memory_space<vmem>>, vector<2x64x128xf32>
    tpu.vector_store %arg7[%c0_12, %c0_13, %c0_14], %8 {strides = array<i32>} : memref<2x64x128xf32, #tpu.memory_space<vmem>>, vector<2x64x128xf32>,
    %c0_15 = arith.constant 0 : index
    %c0_16 = arith.constant 0 : index
    %c128 = arith.constant 128 : index
    %10 = vector.load %arg2[%c0_15, %c0_16, %c128] : memref<2x64x256xf32, #tpu.memory_space<vmem>>, vector<2x64x128xf32>
    %c0_17 = arith.constant 0 : index
    %c0_18 = arith.constant 0 : index
    %c0_19 = arith.constant 0 : index
    %11 = vector.load %arg6[%c0_17, %c0_18, %c0_19] : memref<2x64x128xf32, #tpu.memory_space<vmem>>, vector<2x64x128xf32>
    %12 = arith.addf %11, %10 : vector<2x64x128xf32>
    %c0_20 = arith.constant 0 : index
    %c0_21 = arith.constant 0 : index
    %c0_22 = arith.constant 0 : index
    %13 = vector.load %arg6[%c0_20, %c0_21, %c0_22] : memref<2x64x128xf32, #tpu.memory_space<vmem>>, vector<2x64x128xf32>
    tpu.vector_store %arg6[%c0_20, %c0_21, %c0_22], %12 {strides = array<i32>} : memref<2x64x128xf32, #tpu.memory_space<vmem>>, vector<2x64x128xf32>,
    %c0_23 = arith.constant 0 : index
    %c0_24 = arith.constant 0 : index
    %c0_25 = arith.constant 0 : index
    %14 = vector.load %arg7[%c0_23, %c0_24, %c0_25] : memref<2x64x128xf32, #tpu.memory_space<vmem>>, vector<2x64x128xf32>
    %15 = arith.maximumf %14, %10 : vector<2x64x128xf32>
    %c0_26 = arith.constant 0 : index
    %c0_27 = arith.constant 0 : index
    %c0_28 = arith.constant 0 : index
    %16 = vector.load %arg7[%c0_26, %c0_27, %c0_28] : memref<2x64x128xf32, #tpu.memory_space<vmem>>, vector<2x64x128xf32>
    tpu.vector_store %arg7[%c0_26, %c0_27, %c0_28], %15 {strides = array<i32>} : memref<2x64x128xf32, #tpu.memory_space<vmem>>, vector<2x64x128xf32>,
    %c0_i32_29 = arith.constant 0 : i32
    %17 = arith.cmpi eq, %arg1, %c0_i32_29 : i32
    %18 = arith.extui %17 : i1 to i32
    %c0_i32_30 = arith.constant 0 : i32
    %19 = arith.cmpi ne, %18, %c0_i32_30 : i32
    scf.if %19 {
      %c0_31 = arith.constant 0 : index
      %c0_32 = arith.constant 0 : index
      %c0_33 = arith.constant 0 : index
      %20 = vector.load %arg6[%c0_31, %c0_32, %c0_33] : memref<2x64x128xf32, #tpu.memory_space<vmem>>, vector<2x64x128xf32>
      %cst = arith.constant dense<0.000000e+00> : vector<2x64xf32>
      %21 = vector.multi_reduction <add>, %20, %cst [2] : vector<2x64x128xf32> to vector<2x64xf32>
      %cst_34 = arith.constant 3.906250e-03 : f32
      %22 = vector.broadcast %cst_34 : f32 to vector<2x64xf32>
      %23 = arith.mulf %21, %22 : vector<2x64xf32>
      %c0_35 = arith.constant 0 : index
      %c0_36 = arith.constant 0 : index
      %c0_37 = arith.constant 0 : index
      %24 = vector.load %arg7[%c0_35, %c0_36, %c0_37] : memref<2x64x128xf32, #tpu.memory_space<vmem>>, vector<2x64x128xf32>
      %cst_38 = arith.constant dense<0xFF800000> : vector<2x64xf32>
      %25 = vector.multi_reduction <maximumf>, %24, %cst_38 [2] : vector<2x64x128xf32> to vector<2x64xf32>
      %c0_39 = arith.constant 0 : index
      %c0_40 = arith.constant 0 : index
      %26 = vector.load %arg3[%c0_39, %c0_40] : memref<4x64xf32, #tpu.memory_space<vmem>>, vector<4x64xf32>
      %c0_41 = arith.constant 0 : index
      %c0_42 = arith.constant 0 : index
      %27 = vector.load %arg4[%c0_41, %c0_42] : memref<64x4xf32, #tpu.memory_space<vmem>>, vector<64x4xf32>
      %cst_43 = arith.constant dense<0.000000e+00> : vector<2x4xf32>
      %28 = tpu.matmul %23, %26, %cst_43 {dimension_numbers = #tpu.dot_dimension_numbers<[1], [1], [0], [0], [0, 0, 1, 0], [], []>} : vector<2x64xf32>, vector<4x64xf32>, vector<2x4xf32> -> vector<2x4xf32>
      %cst_44 = arith.constant 0.000000e+00 : f32
      %29 = vector.broadcast %cst_44 : f32 to vector<2x4xf32>
      %30 = arith.maximumf %28, %29 : vector<2x4xf32>
      %cst_45 = arith.constant dense<0.000000e+00> : vector<2x64xf32>
      %31 = tpu.matmul %30, %27, %cst_45 {dimension_numbers = #tpu.dot_dimension_numbers<[1], [1], [0], [0], [0, 0, 1, 0], [], []>} : vector<2x4xf32>, vector<64x4xf32>, vector<2x64xf32> -> vector<2x64xf32>
      %cst_46 = arith.constant dense<0.000000e+00> : vector<2x4xf32>
      %32 = tpu.matmul %25, %26, %cst_46 {dimension_numbers = #tpu.dot_dimension_numbers<[1], [1], [0], [0], [0, 0, 1, 0], [], []>} : vector<2x64xf32>, vector<4x64xf32>, vector<2x4xf32> -> vector<2x4xf32>
      %cst_47 = arith.constant 0.000000e+00 : f32
      %33 = vector.broadcast %cst_47 : f32 to vector<2x4xf32>
      %34 = arith.maximumf %32, %33 : vector<2x4xf32>
      %cst_48 = arith.constant dense<0.000000e+00> : vector<2x64xf32>
      %35 = tpu.matmul %34, %27, %cst_48 {dimension_numbers = #tpu.dot_dimension_numbers<[1], [1], [0], [0], [0, 0, 1, 0], [], []>} : vector<2x4xf32>, vector<64x4xf32>, vector<2x64xf32> -> vector<2x64xf32>
      %36 = arith.addf %31, %35 : vector<2x64xf32>
      %37 = arith.negf %36 : vector<2x64xf32>
      %38 = math.exp %37 : vector<2x64xf32>
      %cst_49 = arith.constant 1.000000e+00 : f32
      %39 = vector.broadcast %cst_49 : f32 to vector<2x64xf32>
      %40 = arith.addf %39, %38 : vector<2x64xf32>
      %41 = arith.divf %39, %40 : vector<2x64xf32>
      %42 = vector.shape_cast %41 : vector<2x64xf32> to vector<2x1x64xf32>
      %c0_50 = arith.constant 0 : index
      %c0_51 = arith.constant 0 : index
      %c0_52 = arith.constant 0 : index
      %43 = vector.load %arg5[%c0_50, %c0_51, %c0_52] : memref<2x1x64xf32, #tpu.memory_space<vmem>>, vector<2x1x64xf32>
      tpu.vector_store %arg5[%c0_50, %c0_51, %c0_52], %42 {strides = array<i32>} : memref<2x1x64xf32, #tpu.memory_space<vmem>>, vector<2x1x64xf32>,
    } else {
    }
    return
  }
  func.func @transform_0(%arg0: i32, %arg1: i32) -> (i32, i32, i32) {
    %c0_i32 = arith.constant 0 : i32
    %c0_i32_0 = arith.constant 0 : i32
    return %arg0, %c0_i32, %arg1 : i32, i32, i32
  }
  func.func @transform_1(%arg0: i32, %arg1: i32) -> (i32, i32) {
    %c0_i32 = arith.constant 0 : i32
    %c0_i32_0 = arith.constant 0 : i32
    %c0_i32_1 = arith.constant 0 : i32
    return %c0_i32, %c0_i32_0 : i32, i32
  }
  func.func @transform_2(%arg0: i32, %arg1: i32) -> (i32, i32) {
    %c0_i32 = arith.constant 0 : i32
    %c0_i32_0 = arith.constant 0 : i32
    %c0_i32_1 = arith.constant 0 : i32
    return %c0_i32, %c0_i32_0 : i32, i32
  }
  func.func @transform_3(%arg0: i32, %arg1: i32) -> (i32, i32, i32) {
    %c0_i32 = arith.constant 0 : i32
    %c0_i32_0 = arith.constant 0 : i32
    %c0_i32_1 = arith.constant 0 : i32
    return %arg0, %c0_i32, %c0_i32_0 : i32, i32, i32
  }
}

</mosaic_0001>

<bundles_post_ra>
// kernel: tpu_custom_call.1
= control target key start
LH: loop header
LB: loop body
LE: loop exit
PB: predicated region body
PF: predicated region fallthrough
CT: control target
= control target key end

     0   :  { %8 = vsyncpa [#allocation5], 0  ;;  %s1427_s0 = inlined_call_operand.hbm [shape: f32[2,64,256], index: 0, kind: input, shape index: {}]   ;;  %s1428_s1 = inlined_call_operand.vmem [shape: f32[4,64], index: 1, kind: input, shape index: {}]   ;;  %s1429_s2 = inlined_call_operand.vmem [shape: f32[64,4], index: 2, kind: input, shape index: {}]   ;;  %s1430_s3 = inlined_call_operand.hbm [shape: f32[2,1,64], index: 3, kind: output, shape index: {}]  }
   0x1   :  { %9 = vsyncpa [#allocation6], 0  ;;  %s1179_s12 = smov [#allocation4]   ;;  %s1131_s16 = scalar_lea.hbm %s1427_s0, 4096 }
   0x2   :  { %s15_s13 = sshll.u32 %s1179_s12, 4  ;;  %p1132_p0 = scmp.ne.s32.totalorder %s1427_s0, %s1131_s16  ;;  %s16_s13 = int_to_ptr.vmem [resolvable:$true] %s15_s13 }
   0x3   :  { %p1135_p1 = scmp.lt.u32.totalorder %s1131_s16, %s1427_s0 }
   0x5   :  { %p1137_p2 = pnand %p1135_p1, %p1132_p0 }
   0x7   :  { %1140 = shalt.err (!%p1137_p2)
}
   0x8   :  { %s1141_s21 = scalar_lea.vmem %s16_s13, 4096  ;;  %p1146_p4 = scmp.lt.s32.totalorder %s16_s13, %s16_s13 }
   0x9   :  { %p1142_p3 = scmp.ne.s32.totalorder %s16_s13, %s1141_s21  ;;  %p1147_p5 = scmp.lt.s32.totalorder %s1141_s21, %s1141_s21 }
   0xb   :  { %p1148_p6 = por %p1147_p5, %p1146_p4 }
   0xd   :  { %p1149_p7 = pnand %p1148_p6, %p1142_p3 }
   0xf   :  { %1152 = shalt.err (!%p1149_p7)
}
  0x10   :  { %s1180_s22 = smov 256   ;;  %s1181_s23 = smov 16  }
  0x11   :  { %21 = dma.hbm_to_vmem [thread:$0]  %s1427_s0, 4096, %s16_s13, [#allocation5], %s1180_s22, %s1180_s22, %s1181_s23  }
  0x12   :  { %1175 = dma.done.wait [#allocation5], 4096  }
  0x13   :  { %1176 = vsyncadd [#allocation5], 4294963200  ;;  %v73_v0 = vld [vmem:[#allocation4 + $0x80] sm:$0xff]  ;;  %v185_v1 = vld [vmem:[#allocation4 + $0x88] sm:$0xff]  ;;  %vm525_vm0 = vcmask 523264   ;;  %vm1183_vm1 = vmmov 0  }
  0x14   :  { %v65_v2 = vld [vmem:[#allocation4] sm:$0xff]  ;;  %v217_v3 = vadd.f32 %v185_v1, %v73_v0  ;;  %v177_v4 = vld [vmem:[#allocation4 + $0x8] sm:$0xff]  ;;  %v74_v5 = vld [vmem:[#allocation4 + $0x90] sm:$0xff]  ;;  %v265_v27 = vmax.f32 %v73_v0, %v185_v1  ;;  %v1182_v0 = vmov 0.0   ;;  %vm440_vm2 = vcmask 130112  }
  0x15   :  { %v186_v6 = vld [vmem:[#allocation4 + $0x98] sm:$0xff]  ;;  %v209_v7 = vadd.f32 %v177_v4, %v65_v2  ;;  %v66_v8 = vld [vmem:[#allocation4 + $0x10] sm:$0xff]  ;;  %v75_v12 = vld [vmem:[#allocation4 + $0xa0] sm:$0xff]  ;;  %v257_v25 = vmax.f32 %v65_v2, %v177_v4  ;;  %1037 = vmatprep.subr.mxu0 %v1182_v0  ;;  %1042 = vmatprep.subr.mxu1 %v1182_v0  ;;  %v1184_v2 = vmov 0.0|0.0   ;;  %vm447_vm3 = vcmask 195712  }
  0x16   :  { %v178_v9 = vld [vmem:[#allocation4 + $0x18] sm:$0xff]  ;;  %324 = vadd.xlane.f32.xlu1 %v217_v3  ;;  %v218_v10 = vadd.f32 %v186_v6, %v74_v5  ;;  %v187_v13 = vld [vmem:[#allocation4 + $0xa8] sm:$0xff]  ;;  %v67_v14 = vld [vmem:[#allocation4 + $0x20] sm:$0xff]  ;;  %v266_v26 = vmax.f32 %v74_v5, %v186_v6  ;;  %1039 = vmatprep.mubr.msk.f32.mxu0 %vm1183_vm1, %v1182_v0  ;;  %vm454_vm4 = vcmask 261312   ;;  %vm461_vm5 = vcmask 326912  }
  0x17   :  { %308 = vadd.xlane.f32.xlu0 %v209_v7  ;;  %v210_v11 = vadd.f32 %v178_v9, %v66_v8  ;;  %v179_v15 = vld [vmem:[#allocation4 + $0x28] sm:$0xff]  ;;  %v219_v16 = vadd.f32 %v187_v13, %v75_v12  ;;  %v76_v18 = vld [vmem:[#allocation4 + $0xb0] sm:$0xff]  ;;  %v188_v19 = vld [vmem:[#allocation4 + $0xb8] sm:$0xff]  ;;  %v258_v24 = vmax.f32 %v66_v8, %v178_v9  ;;  %v267_v34 = vmax.f32 %v75_v12, %v187_v13 }
  0x18   :  { %v211_v17 = vadd.f32 %v179_v15, %v67_v14  ;;  %v68_v20 = vld [vmem:[#allocation4 + $0x30] sm:$0xff]  ;;  %v180_v21 = vld [vmem:[#allocation4 + $0x38] sm:$0xff]  ;;  %v220_v22 = vadd.f32 %v188_v19, %v76_v18  ;;  %v77_v28 = vld [vmem:[#allocation4 + $0xc0] sm:$0xff]  ;;  %v259_v35 = vmax.f32 %v67_v14, %v179_v15  ;;  %v268_v42 = vmax.f32 %v76_v18, %v188_v19  ;;  %1044 = vmatprep.mubr.msk.f32.mxu1 %vm1183_vm1, %v1182_v0 }
  0x19   :  { %v212_v23 = vadd.f32 %v180_v21, %v68_v20  ;;  %v189_v29 = vld [vmem:[#allocation4 + $0xc8] sm:$0xff]  ;;  %v69_v30 = vld [vmem:[#allocation4 + $0x40] sm:$0xff]  ;;  %v78_v36 = vld [vmem:[#allocation4 + $0xd0] sm:$0xff]  ;;  %v260_v43 = vmax.f32 %v68_v20, %v180_v21  ;;  %vm468_vm6 = vcmask 392512   ;;  %vm475_vm7 = vcmask 458112  }
  0x1a   :  { %326 = vadd.xlane.f32.xlu1 %v218_v10  ;;  %v181_v31 = vld [vmem:[#allocation4 + $0x48] sm:$0xff]  ;;  %v221_v32 = vadd.f32 %v189_v29, %v77_v28  ;;  %v190_v37 = vld [vmem:[#allocation4 + $0xd8] sm:$0xff]  ;;  %v70_v38 = vld [vmem:[#allocation4 + $0x50] sm:$0xff]  ;;  %v269_v50 = vmax.f32 %v77_v28, %v189_v29  ;;  %vm482_vm8 = vcmask 523712   ;;  %vm523_vm9 = vcmask 1041409  }
  0x1b   :  { %310 = vadd.xlane.f32.xlu0 %v210_v11  ;;  %v213_v33 = vadd.f32 %v181_v31, %v69_v30  ;;  %v182_v39 = vld [vmem:[#allocation4 + $0x58] sm:$0xff]  ;;  %v222_v40 = vadd.f32 %v190_v37, %v78_v36  ;;  %v79_v44 = vld [vmem:[#allocation4 + $0xe0] sm:$0xff]  ;;  %v191_v45 = vld [vmem:[#allocation4 + $0xe8] sm:$0xff]  ;;  %v261_v51 = vmax.f32 %v69_v30, %v181_v31  ;;  %v270_v58 = vmax.f32 %v78_v36, %v190_v37 }
  0x1c   :  { %v214_v41 = vadd.f32 %v182_v39, %v70_v38  ;;  %v71_v46 = vld [vmem:[#allocation4 + $0x60] sm:$0xff]  ;;  %v183_v47 = vld [vmem:[#allocation4 + $0x68] sm:$0xff]  ;;  %v223_v48 = vadd.f32 %v191_v45, %v79_v44  ;;  %v80_v52 = vld [vmem:[#allocation4 + $0xf0] sm:$0xff]  ;;  %v262_v59 = vmax.f32 %v70_v38, %v182_v39  ;;  %v271_v60 = vmax.f32 %v79_v44, %v191_v45 }
  0x1d   :  { %v215_v49 = vadd.f32 %v183_v47, %v71_v46  ;;  %v192_v53 = vld [vmem:[#allocation4 + $0xf8] sm:$0xff]  ;;  %v72_v54 = vld [vmem:[#allocation4 + $0x70] sm:$0xff]  ;;  %v263_v61 = vmax.f32 %v71_v46, %v183_v47  ;;  %v404_v1 = vld [vmem:[%s1428_s1] sm:$0xf]  ;;  %vm770_vm10 = vcmask 31744   ;;  %vm972_vm12 = vcmask 516096  }
  0x1e   :  { %328 = vadd.xlane.f32.xlu1 %v219_v16  ;;  %v184_v55 = vld [vmem:[#allocation4 + $0x78] sm:$0xff]  ;;  %v224_v56 = vadd.f32 %v192_v53, %v80_v52  ;;  %v272_v62 = vmax.f32 %v80_v52, %v192_v53  ;;  %1038 = vmatpush3.xpose.msk.msra.mxu0 %vm525_vm0, %v404_v1  ;;  %vm1328_vm11 = vmpackc.low %vm770_vm10, %vm770_vm10 }
  0x1f   :  { %312 = vadd.xlane.f32.xlu0 %v211_v17  ;;  %v216_v57 = vadd.f32 %v184_v55, %v72_v54  ;;  %v264_v63 = vmax.f32 %v72_v54, %v184_v55  ;;  %1043 = vmatpush3.xpose.msk.msra.mxu1 %vm525_vm0, %v404_v1  ;;  %v429_v17 = vlaneseq }
  0x20   :  { %1101 = vmatprep.subr.bf16.mxu0 %v1184_v2  ;;  %1085 = vmatprep.subr.bf16.mxu1 %v1184_v2 }
  0x21   :  { %v430_v20 = vand.u32 127, %v429_v17 }
  0x22   :  { %330 = vadd.xlane.f32.xlu1 %v220_v22  ;;  %v1246_v22 = vshrl.u32 %v429_v17, 7 }
  0x23   :  { %314 = vadd.xlane.f32.xlu0 %v212_v23  ;;  %v435_v23 = vadd.s32 4294967288, %v430_v20  ;;  %v463_v28 = vadd.s32 4294967256, %v430_v20  ;;  %v470_v37 = vadd.s32 4294967248, %v430_v20 }
  0x24   :  { %v1251_v30 = vsub.s32 %v430_v20, %v1246_v22 }
  0x25   :  { %v1254_v31 = vsub.s32 %v435_v23, %v1246_v22  ;;  %v1272_v53 = vsub.s32 %v470_v37, %v1246_v22 }
  0x26   :  { %374 = vmax.xlane.f32.xlu1 %v258_v24 }
  0x27   :  { %372 = vmax.xlane.f32.xlu0 %v257_v25  ;;  %v442_v25 = vadd.s32 4294967280, %v430_v20 }
  0x2a   :  { %390 = vmax.xlane.f32.xlu1 %v266_v26  ;;  %v449_v26 = vadd.s32 4294967272, %v430_v20 }
  0x2b   :  { %388 = vmax.xlane.f32.xlu0 %v265_v27  ;;  %v456_v27 = vadd.s32 4294967264, %v430_v20 }
  0x2d   :  { %v1265_v36 = vsub.s32 %v456_v27, %v1246_v22  ;;  %v406_v27 = vld [vmem:[%s1429_s2 + $0x8] sm:$0xff] }
  0x2e   :  { %332 = vadd.xlane.f32.xlu1 %v221_v32 }
  0x2f   :  { %316 = vadd.xlane.f32.xlu0 %v213_v33  ;;  %v1259_v33 = vsub.s32 %v442_v25, %v1246_v22 }
  0x32   :  { %392 = vmax.xlane.f32.xlu1 %v267_v34  ;;  %v1262_v34 = vsub.s32 %v449_v26, %v1246_v22  ;;  %v405_v26 = vld [vmem:[%s1429_s2] sm:$0xff] }
  0x33   :  { %376 = vmax.xlane.f32.xlu0 %v259_v35 }
  0x36   :  { %334 = vadd.xlane.f32.xlu1 %v222_v40  ;;  %v1268_v40 = vsub.s32 %v463_v28, %v1246_v22 }
  0x37   :  { %318 = vadd.xlane.f32.xlu0 %v214_v41 }
  0x3a   :  { %394 = vmax.xlane.f32.xlu1 %v268_v42 }
  0x3b   :  { %378 = vmax.xlane.f32.xlu0 %v260_v43 }
  0x3e   :  { %336 = vadd.xlane.f32.xlu1 %v223_v48 }
  0x3f   :  { %320 = vadd.xlane.f32.xlu0 %v215_v49  ;;  %v477_v49 = vadd.s32 4294967240, %v430_v20 }
  0x42   :  { %396 = vmax.xlane.f32.xlu1 %v269_v50 }
  0x43   :  { %380 = vmax.xlane.f32.xlu0 %v261_v51 }
  0x46   :  { %338 = vadd.xlane.f32.xlu1 %v224_v56 }
  0x47   :  { %322 = vadd.xlane.f32.xlu0 %v216_v57 }
  0x4a   :  { %398 = vmax.xlane.f32.xlu1 %v270_v58 }
  0x4b   :  { %382 = vmax.xlane.f32.xlu0 %v262_v59 }
  0x4e   :  { %400 = vmax.xlane.f32.xlu1 %v271_v60 }
  0x4f   :  { %384 = vmax.xlane.f32.xlu0 %v263_v61 }
  0x52   :  { %402 = vmax.xlane.f32.xlu1 %v272_v62 }
  0x53   :  { %386 = vmax.xlane.f32.xlu0 %v264_v63 }
  0xa3   :  { %v325_v3 = vpop.xlane.xlu1 %324 }
  0xa4   :  { %v309_v4 = vpop.xlane.xlu0 %308  ;;  %v348_v42 = vmul.f32 0.00390625, %v325_v3 }
  0xa5   :  { %v340_v46 = vmul.f32 0.00390625, %v309_v4 }
  0xa6   :  { %v487_v59 = vrot.slane %v348_v42, %v1251_v30 }
  0xa7   :  { %v327_v5 = vpop.xlane.xlu1 %326  ;;  %v434_v1 = vrot.slane %v340_v46, %v1251_v30  ;;  %v1086_v46 = vpack.c.bf16 %v406_v27, %v405_v26  ;;  %v412_v26 = vld [vmem:[%s1429_s2 + $0x38] sm:$0xff] }
  0xa8   :  { %v311_v6 = vpop.xlane.xlu0 %310  ;;  %v349_v35 = vmul.f32 0.00390625, %v327_v5  ;;  %v1287_v5 = vsub.s32 %v477_v49, %v1246_v22 }
  0xa9   :  { %v341_v38 = vmul.f32 0.00390625, %v311_v6 }
  0xaa   :  { %v491_v50 = vrot.slane %v349_v35, %v1254_v31 }
  0xab   :  { %v329_v7 = vpop.xlane.xlu1 %328  ;;  %v439_v54 = vrot.slane %v341_v38, %v1254_v31 }
  0xac   :  { %v313_v8 = vpop.xlane.xlu0 %312  ;;  %v350_v39 = vmul.f32 0.00390625, %v329_v7  ;;  %v492_v6 = vsel %vm440_vm2, %v491_v50, %v487_v59 }
  0xad   :  { %v342_v43 = vmul.f32 0.00390625, %v313_v8 }
  0xae   :  { %v496_v55 = vrot.slane %v350_v39, %v1259_v33 }
  0xaf   :  { %v331_v9 = vpop.xlane.xlu1 %330  ;;  %v446_v60 = vrot.slane %v342_v43, %v1259_v33 }
  0xb0   :  { %v315_v10 = vpop.xlane.xlu0 %314  ;;  %v351_v44 = vmul.f32 0.00390625, %v331_v9  ;;  %v441_v9 = vsel %vm440_vm2, %v439_v54, %v434_v1 }
  0xb1   :  { %v343_v47 = vmul.f32 0.00390625, %v315_v10  ;;  %v497_v10 = vsel %vm447_vm3, %v496_v55, %v492_v6  ;;  %v448_v20 = vsel %vm447_vm3, %v446_v60, %v441_v9  ;;  %v408_v60 = vld [vmem:[%s1429_s2 + $0x18] sm:$0xff] }
  0xb2   :  { %v501_v61 = vrot.slane %v351_v44, %v1262_v34 }
  0xb3   :  { %v1234_v11 = vpop.xlane.xlu1 %374  ;;  %v453_v3 = vrot.slane %v343_v47, %v1262_v34 }
  0xb4   :  { %v1236_v12 = vpop.xlane.xlu0 %372 }
  0xb5   :  { %v455_v28 = vsel %vm454_vm4, %v453_v3, %v448_v20  ;;  %v621_v54 = vrot.slane %v1236_v12, %v1251_v30 }
  0xb7   :  { %v1238_v13 = vpop.xlane.xlu1 %390 }
  0xb8   :  { %v1240_v14 = vpop.xlane.xlu0 %388  ;;  %v664_v47 = vrot.slane %v1238_v13, %v1254_v31 }
  0xbb   :  { %v333_v15 = vpop.xlane.xlu1 %332 }
  0xbc   :  { %v317_v16 = vpop.xlane.xlu0 %316  ;;  %v352_v48 = vmul.f32 0.00390625, %v333_v15 }
  0xbd   :  { %v344_v51 = vmul.f32 0.00390625, %v317_v16 }
  0xbe   :  { %v506_v4 = vrot.slane %v352_v48, %v1265_v36  ;;  %v660_v48 = vrot.slane %v1240_v14, %v1251_v30 }
  0xbf   :  { %v1242_v18 = vpop.xlane.xlu1 %392  ;;  %v460_v7 = vrot.slane %v344_v51, %v1265_v36 }
  0xc0   :  { %v1244_v19 = vpop.xlane.xlu0 %376  ;;  %v669_v55 = vrot.slane %v1242_v18, %v1259_v33 }
  0xc1   :  { %v462_v38 = vsel %vm461_vm5, %v460_v7, %v455_v28  ;;  %v630_v14 = vrot.slane %v1244_v19, %v1259_v33 }
  0xc3   :  { %v335_v21 = vpop.xlane.xlu1 %334 }
  0xc4   :  { %v319_v24 = vpop.xlane.xlu0 %318  ;;  %v353_v52 = vmul.f32 0.00390625, %v335_v21  ;;  %v502_v21 = vsel %vm454_vm4, %v501_v61, %v497_v10 }
  0xc5   :  { %v345_v56 = vmul.f32 0.00390625, %v319_v24  ;;  %v507_v35 = vsel %vm461_vm5, %v506_v4, %v502_v21 }
  0xc6   :  { %v511_v8 = vrot.slane %v353_v52, %v1268_v40  ;;  %v625_v52 = vrot.slane %v1234_v11, %v1254_v31 }
  0xc7   :  { %v1248_v29 = vpop.xlane.xlu1 %394  ;;  %v467_v15 = vrot.slane %v345_v56, %v1268_v40 }
  0xc8   :  { %v1256_v32 = vpop.xlane.xlu0 %378  ;;  %v512_v39 = vsel %vm468_vm6, %v511_v8, %v507_v35  ;;  %v674_v11 = vrot.slane %v1248_v29, %v1262_v34  ;;  %v626_v29 = vsel %vm440_vm2, %v625_v52, %v621_v54 }
  0xc9   :  { %v469_v42 = vsel %vm468_vm6, %v467_v15, %v462_v38  ;;  %v635_v12 = vrot.slane %v1256_v32, %v1262_v34  ;;  %v631_v61 = vsel %vm447_vm3, %v630_v14, %v626_v29 }
  0xcb   :  { %v337_v41 = vpop.xlane.xlu1 %336 }
  0xcc   :  { %v321_v45 = vpop.xlane.xlu0 %320  ;;  %v354_v57 = vmul.f32 0.00390625, %v337_v41 }
  0xcd   :  { %v346_v62 = vmul.f32 0.00390625, %v321_v45 }
  0xce   :  { %v516_v16 = vrot.slane %v354_v57, %v1272_v53  ;;  %v665_v57 = vsel %vm440_vm2, %v664_v47, %v660_v48  ;;  %v1185_v48 = vmov 1966171168  }
  0xcf   :  { %v1276_v58 = vpop.xlane.xlu1 %396  ;;  %v474_v23 = vrot.slane %v346_v62, %v1272_v53  ;;  %v670_v32 = vsel %vm447_vm3, %v669_v55, %v665_v57 }
  0xd0   :  { %v1281_v63 = vpop.xlane.xlu0 %380  ;;  %v517_v43 = vsel %vm475_vm7, %v516_v16, %v512_v39  ;;  %v679_v18 = vrot.slane %v1276_v58, %v1265_v36  ;;  %v675_v62 = vsel %vm454_vm4, %v674_v11, %v670_v32 }
  0xd1   :  { %v476_v49 = vsel %vm475_vm7, %v474_v23, %v469_v42  ;;  %v640_v59 = vrot.slane %v1281_v63, %v1265_v36  ;;  %v407_v36 = vld [vmem:[%s1429_s2 + $0x10] sm:$0xff]  ;;  %v409_v23 = vld [vmem:[%s1429_s2 + $0x20] sm:$0xff] }
  0xd2   :  { %v680_v1 = vsel %vm461_vm5, %v679_v18, %v675_v62  ;;  %v1090_v9 = vpack.c.bf16 %v408_v60, %v407_v36 }
  0xd3   :  { %v339_v17 = vpop.xlane.xlu1 %338 }
  0xd4   :  { %v355_v24 = vmul.f32 0.00390625, %v339_v17  ;;  %v323_v25 = vpop.xlane.xlu0 %322 }
  0xd5   :  { %v347_v37 = vmul.f32 0.00390625, %v323_v25  ;;  %v411_v25 = vld [vmem:[%s1429_s2 + $0x30] sm:$0xff] }
  0xd6   :  { %v521_v41 = vrot.slane %v355_v24, %v1287_v5 }
  0xd7   :  { %v481_v44 = vrot.slane %v347_v37, %v1287_v5  ;;  %v399_v45 = vpop.xlane.xlu1 %398 }
  0xd8   :  { %v383_v50 = vpop.xlane.xlu0 %382  ;;  %v522_v51 = vsel %vm482_vm8, %v521_v41, %v517_v43  ;;  %v684_v19 = vrot.slane %v399_v45, %v1268_v40 }
  0xd9   :  { %v483_v56 = vsel %vm482_vm8, %v481_v44, %v476_v49  ;;  %v645_v34 = vrot.slane %v383_v50, %v1268_v40  ;;  %v636_v40 = vsel %vm454_vm4, %v635_v12, %v631_v61  ;;  %v949_v49 = vunpack.c.l.s4 %v1185_v48 }
  0xda   :  { %v524_v31 = vsel %vm523_vm9, %v522_v51, %v483_v56  ;;  %v641_v4 = vsel %vm461_vm5, %v640_v59, %v636_v40  ;;  %v685_v6 = vsel %vm468_vm6, %v684_v19, %v680_v1 }
  0xdb   :  { %1040 = vmatmul.mubr.msk.f32.vlgmr.msra.gmra.mrb[0].mxu0 %vm525_vm0, %v524_v31  ;;  %v401_v30 = vpop.xlane.xlu1 %400  ;;  %v646_v10 = vsel %vm468_vm6, %v645_v34, %v641_v4  ;;  %v950_v50 = vunpack.c.0.s8 %v949_v49 }
  0xdc   :  { %v385_v33 = vpop.xlane.xlu0 %384  ;;  %1104 = vmatpush3.bf16.xpose.msk.msra.mxu0 %vm1328_vm11, %v1086_v46  ;;  %1082 = vmatprep.mubr.msk.f32.mxu0 %vm1183_vm1, %v1182_v0  ;;  %v689_v58 = vrot.slane %v401_v30, %v1272_v53 }
  0xdd   :  { %1105 = vmatprep.subr.bf16.mxu0 %v1184_v2  ;;  %v650_v63 = vrot.slane %v385_v33, %v1272_v53  ;;  %v953_v51 = vsub.s32 %v950_v50, %v1246_v22 }
  0xde   :  { %v690_v15 = vsel %vm475_vm7, %v689_v58, %v685_v6 }
  0xdf   :  { %v403_v3 = vpop.xlane.xlu1 %402  ;;  %v651_v53 = vsel %vm475_vm7, %v650_v63, %v646_v10 }
  0xe0   :  { %v694_v7 = vrot.slane %v403_v3, %v1287_v5  ;;  %v387_v8 = vpop.xlane.xlu0 %386 }
  0xe1   :  { %v655_v16 = vrot.slane %v387_v8, %v1287_v5  ;;  %v410_v5 = vld [vmem:[%s1429_s2 + $0x28] sm:$0xff]  ;;  %s1186_s2 = smov [#allocation7]  }
  0xe2   :  { %v695_v17 = vsel %vm482_vm8, %v694_v7, %v690_v15  ;;  %v1094_v24 = vpack.c.bf16 %v410_v5, %v409_v23  ;;  %s980_s15 = sshll.u32 %s1186_s2, 4  ;;  %s981_s15 = int_to_ptr.vmem [resolvable:$true] %s980_s15 }
  0xe3   :  { %v656_v20 = vsel %vm482_vm8, %v655_v16, %v651_v53  ;;  %s1153_s16 = scalar_lea.vmem %s981_s15, 32  ;;  %p1158_p9 = scmp.lt.s32.totalorder %s981_s15, %s981_s15 }
  0xe4   :  { %v696_v21 = vsel %vm523_vm9, %v695_v17, %v656_v20  ;;  %1108 = vmatpush3.bf16.xpose.msk.msra.mxu0 %vm1328_vm11, %v1090_v9  ;;  %p1154_p8 = scmp.ne.s32.totalorder %s981_s15, %s1153_s16  ;;  %p1159_p10 = scmp.lt.s32.totalorder %s1153_s16, %s1153_s16 }
  0xe5   :  { %1045 = vmatmul.mubr.msk.f32.vlgmr.msra.gmra.mrb[0].mxu1 %vm525_vm0, %v696_v21  ;;  %1109 = vmatprep.subr.bf16.mxu0 %v1184_v2 }
  0xe6   :  { %1088 = vmatpush3.bf16.xpose.msk.msra.mxu1 %vm1328_vm11, %v1086_v46  ;;  %1063 = vmatprep.mubr.msk.f32.mxu1 %vm1183_vm1, %v1182_v0  ;;  %v1098_v0 = vpack.c.bf16 %v412_v26, %v411_v25  ;;  %p1160_p11 = por %p1159_p10, %p1158_p9 }
  0xe7   :  { %1089 = vmatprep.subr.bf16.mxu1 %v1184_v2 }
  0xe8   :  { %p1161_p12 = pnand %p1160_p11, %p1154_p8 }
  0xec   :  { %1112 = vmatpush3.bf16.xpose.msk.msra.mxu0 %vm1328_vm11, %v1094_v24 }
  0xed   :  { %1113 = vmatprep.subr.bf16.mxu0 %v1184_v2 }
  0xee   :  { %1092 = vmatpush3.bf16.xpose.msk.msra.mxu1 %vm1328_vm11, %v1090_v9 }
  0xef   :  { %1093 = vmatprep.subr.bf16.mxu1 %v1184_v2 }
  0xf4   :  { %1116 = vmatpush3.bf16.xpose.msk.msra.mxu0 %vm1328_vm11, %v1098_v0 }
  0xf6   :  { %1096 = vmatpush3.bf16.xpose.msk.msra.mxu1 %vm1328_vm11, %v1094_v24 }
  0xf7   :  { %1097 = vmatprep.subr.bf16.mxu1 %v1184_v2 }
  0xfe   :  { %1100 = vmatpush3.bf16.xpose.msk.msra.mxu1 %vm1328_vm11, %v1098_v0 }
 0x1ae   :  { %v597_v27 = vpop.f32.mrb[0].mxu0 }
 0x1af   :  { %v601_v28 = vmax.f32 %v597_v27, 0.0  ;;  %v1041_v35 = vpop.f32.mrb[1].mxu0 }
 0x1b1   :  { %1083 = vmatmul.mubr.msk.f32.vlgmr.msra.gmra.mrb[2].mxu0 %vm770_vm10, %v601_v28 }
 0x1b8   :  { %v765_v37 = vpop.f32.mrb[0].mxu1 }
 0x1b9   :  { %v769_v38 = vmax.f32 %v765_v37, 0.0  ;;  %v1046_v39 = vpop.f32.mrb[1].mxu1 }
 0x1bb   :  { %1064 = vmatmul.mubr.msk.f32.vlgmr.msra.gmra.mrb[2].mxu1 %vm770_vm10, %v769_v38 }
 0x284   :  { %v937_v41 = vpop.f32.mrb[2].mxu0 }
 0x285   :  { %v1084_v42 = vpop.f32.mrb[3].mxu0 }
 0x28e   :  { %v864_v43 = vpop.f32.mrb[2].mxu1 }
 0x28f   :  { %v938_v44 = vadd.f32 %v937_v41, %v864_v43  ;;  %v1065_v45 = vpop.f32.mrb[3].mxu1 }
 0x291   :  { %v1014_v46 = vmul.f32 -1.442695, %v938_v44 }
 0x293   :  { %1127 = vpow2.f32 %v1014_v46 }
 0x29d   :  { %v1128_v2 = vpop.eup %1127 }
 0x29e   :  { %v944_v47 = vadd.f32 1.0, %v1128_v2 }
 0x2a0   :  { %1129 = vrcp.f32 %v944_v47 }
 0x2aa   :  { %v1130_v52 = vpop.eup %1129 }
 0x2ab   :  { %v954_v54 = vrot.slane %v1130_v52, %v953_v51 }
 0x2ad   :  { %v955_v55 = vcombine.high %v954_v54, %v954_v54  ;;  %v962_v56 = vrot.slane %v954_v54, %v953_v51 }
 0x2af   :  { %v969_v13 = vrot.slane %v955_v55, %v953_v51  ;;  %973 = vst.msk [vmem:[#allocation7] sm:$0x1] %vm972_vm12, %v962_v56 }
 0x2b1   :  { %974 = vst.msk [vmem:[#allocation7 + $0x1] sm:$0x1] %vm972_vm12, %v969_v13 }
 0x2b2   :  { %1164 = shalt.err (!%p1161_p12)
}
 0x2b3   :  { %s1165_s19 = scalar_lea.hbm %s1430_s3, 32 }
 0x2b4   :  { %p1166_p13 = scmp.ne.s32.totalorder %s1430_s3, %s1165_s19  ;;  %p1169_p0 = scmp.lt.u32.totalorder %s1165_s19, %s1430_s3 }
 0x2b6   :  { %p1171_p1 = pnand %p1169_p0, %p1166_p13 }
 0x2b8   :  { %1174 = shalt.err (!%p1171_p1)
}
 0x2b9   :  { %s1187_s25 = smov 1  }
 0x2ba   :  { %986 = dma.vmem_to_hbm [thread:$0]  %s981_s15, 32, %s1430_s3, [#allocation6], %s1181_s23, %s1181_s23, %s1187_s25  }
 0x2bb   :  { %1177 = dma.done.wait [#allocation6], 32  }
 0x2bc   :  { %1178 = vsyncadd [#allocation6], 4294967264 }
 0x2bd   :  { %990 = vsyncpa [#allocation5], 1 }
 0x2be   :  { %991 = vsyncpa [#allocation6], 1 }

</bundles_post_ra>
